<compile_context>
chip_gen: v6e
topology: v6e:2x2x1
jax: 0.10.0
libtpu: 0.0.40
codegen_flags: <defaults>
</compile_context>

<pallas_src>
import math

import jax
import jax.numpy as jnp
import numpy as np
from jax.experimental import pallas as pl
from jax.experimental.pallas import tpu as pltpu


def attention_kernel(x_ref, w_ref, b_ref, o_ref):
    # x_ref: (TB, S, F) block, w_ref: (1, F), b_ref: (1, S), o_ref: (TB, F)
    x = x_ref[...].astype(jnp.float32)          # (TB, S, F)
    w = w_ref[...].astype(jnp.float32)          # (1, F)
    b = b_ref[...].astype(jnp.float32)          # (1, S)

    # score: e = tanh(sum_F(x * w) + b)  -> (TB, S)
    # (VPU multiply + XLU lane reduce; no MXU use.)
    e = jnp.sum(x * w[:, None, :], axis=-1) + b
    e = jnp.tanh(e)
    a = jnp.exp(e)                              # (TB, S)
    # NOTE: epsilon is added after the division, exactly like the PyTorch code.
    a = a / jnp.sum(a, axis=-1, keepdims=True) + 1e-10

    # Weighted sum over the step dimension -> (TB, F), stored as one dense block.
    out = jnp.sum(x * a[:, :, None], axis=1)
    o_ref[...] = out.astype(o_ref.dtype)


def attention_forward(x, weight, bias, *, block_b=1024):
    """x: (B, S, F), weight: (F, 1), bias: (S,) -> (B, F)."""
    B, S, F = x.shape
    # TB: either the whole batch (small B) or a multiple-of-8 tile (large B);
    # both satisfy the TPU (8, 128)-or-full-dim block constraint, and Pallas
    # masks the partial last block when B % TB != 0.
    TB = B if B <= block_b else block_b

    w2d = weight.reshape(1, F)   # lane-major weight tile
    b2d = bias.reshape(1, S)     # lane-major bias tile

    return pl.pallas_call(
        attention_kernel,
        out_shape=jax.ShapeDtypeStruct((B, F), x.dtype),
        grid_spec=pltpu.PrefetchScalarGridSpec(
            num_scalar_prefetch=0,
            grid=(pl.cdiv(B, TB),),
            in_specs=[
                pl.BlockSpec((TB, S, F), lambda i: (i, 0, 0)),  # x: TB rows per step
                pl.BlockSpec((1, F), lambda i: (0, 0)),         # weight (resident)
                pl.BlockSpec((1, S), lambda i: (0, 0)),         # bias   (resident)
            ],
            out_specs=pl.BlockSpec((TB, F), lambda i: (i, 0)),
        ),
        compiler_params=pltpu.CompilerParams(
            dimension_semantics=("parallel",),
        ),
    )(x, w2d, b2d)


def attention_reference(x, weight, bias):
    B, S, F = x.shape
    eij = (x.reshape(-1, F) @ weight).reshape(B, S) + bias[None, :]
    eij = jnp.tanh(eij)
    a = jnp.exp(eij)
    a = a / jnp.sum(a, axis=1, keepdims=True) + 1e-10
    return jnp.sum(x * a[:, :, None], axis=1)


if __name__ == "__main__":
    # Module hyper-params (small, consistent with the forward pass)
    batch = 2
    step_dim = 8        # S
    feature_dim = 32    # F

    key = jax.random.PRNGKey(0)
    kx, kw = jax.random.split(key)

    # Input (B, S, F)
    x = jax.random.normal(kx, (batch, step_dim, feature_dim), dtype=jnp.float32)

    # Deterministic parameter init mirroring nn.init.xavier_uniform_ on (F, 1):
    # fan_in = 1, fan_out = feature_dim -> bound = sqrt(6 / (F + 1))
    bound = math.sqrt(6.0 / (feature_dim + 1))
    weight = jax.random.uniform(
        kw, (feature_dim, 1), minval=-bound, maxval=bound, dtype=jnp.float32
    )
    bias = jnp.zeros((step_dim,), dtype=jnp.float32)  # nn.Parameter(torch.zeros(step_dim))

    out = attention_forward(x, weight, bias)
    out = jax.block_until_ready(out)

    ref = attention_reference(x, weight, bias)
    assert out.shape == (batch, feature_dim)
    assert np.allclose(np.asarray(out), np.asarray(ref), rtol=1e-5, atol=1e-5)

    print("KERNEL_OK")
</pallas_src>

<mosaic_0001>
module attributes {stable_mosaic.version = 11 : i64} {
  func.func @attention_kernel(%arg0: i32, %arg1: memref<2x8x32xf32, #tpu.memory_space<vmem>>, %arg2: memref<1x32xf32, #tpu.memory_space<vmem>>, %arg3: memref<1x8xf32, #tpu.memory_space<vmem>>, %arg4: memref<2x32xf32, #tpu.memory_space<vmem>>) attributes {dimension_semantics = [#tpu.dimension_semantics<parallel>], iteration_bounds = array<i64: 1>, scalar_prefetch = 0 : i64, scratch_operands = 0 : i64, tpu.core_type = #tpu.core_type<tc>, window_params = [{transform_indices = @transform_0, window_bounds = array<i64: 2, 8, 32>}, {pipeline_mode = #tpu.pipeline_mode<synchronous>, transform_indices = @transform_1, window_bounds = array<i64: 1, 32>}, {pipeline_mode = #tpu.pipeline_mode<synchronous>, transform_indices = @transform_2, window_bounds = array<i64: 1, 8>}, {transform_indices = @transform_3, window_bounds = array<i64: 2, 32>}]} {
    %c0 = arith.constant 0 : index
    %c0_0 = arith.constant 0 : index
    %c0_1 = arith.constant 0 : index
    %0 = vector.load %arg1[%c0, %c0_0, %c0_1] : memref<2x8x32xf32, #tpu.memory_space<vmem>>, vector<2x8x32xf32>
    %c0_2 = arith.constant 0 : index
    %c0_3 = arith.constant 0 : index
    %1 = vector.load %arg2[%c0_2, %c0_3] : memref<1x32xf32, #tpu.memory_space<vmem>>, vector<1x32xf32>
    %c0_4 = arith.constant 0 : index
    %c0_5 = arith.constant 0 : index
    %2 = vector.load %arg3[%c0_4, %c0_5] : memref<1x8xf32, #tpu.memory_space<vmem>>, vector<1x8xf32>
    %3 = vector.shape_cast %1 : vector<1x32xf32> to vector<1x1x32xf32>
    %4 = vector.broadcast %3 : vector<1x1x32xf32> to vector<2x8x32xf32>
    %5 = arith.mulf %0, %4 : vector<2x8x32xf32>
    %cst = arith.constant dense<0.000000e+00> : vector<2x8xf32>
    %6 = vector.multi_reduction <add>, %5, %cst [2] : vector<2x8x32xf32> to vector<2x8xf32>
    %7 = vector.broadcast %2 : vector<1x8xf32> to vector<2x8xf32>
    %8 = arith.addf %6, %7 : vector<2x8xf32>
    %9 = math.tanh %8 : vector<2x8xf32>
    %10 = math.exp %9 : vector<2x8xf32>
    %cst_6 = arith.constant dense<0.000000e+00> : vector<2xf32>
    %11 = vector.multi_reduction <add>, %10, %cst_6 [1] : vector<2x8xf32> to vector<2xf32>
    %12 = vector.shape_cast %11 : vector<2xf32> to vector<2x1xf32>
    %13 = vector.broadcast %12 : vector<2x1xf32> to vector<2x8xf32>
    %14 = arith.divf %10, %13 : vector<2x8xf32>
    %cst_7 = arith.constant 1.000000e-10 : f32
    %15 = vector.broadcast %cst_7 : f32 to vector<2x8xf32>
    %16 = arith.addf %14, %15 : vector<2x8xf32>
    %17 = vector.shape_cast %16 : vector<2x8xf32> to vector<2x8x1xf32>
    %18 = vector.broadcast %17 : vector<2x8x1xf32> to vector<2x8x32xf32>
    %19 = arith.mulf %0, %18 : vector<2x8x32xf32>
    %cst_8 = arith.constant dense<0.000000e+00> : vector<2x32xf32>
    %20 = vector.multi_reduction <add>, %19, %cst_8 [1] : vector<2x8x32xf32> to vector<2x32xf32>
    %c0_9 = arith.constant 0 : index
    %c0_10 = arith.constant 0 : index
    %21 = vector.load %arg4[%c0_9, %c0_10] : memref<2x32xf32, #tpu.memory_space<vmem>>, vector<2x32xf32>
    tpu.vector_store %arg4[%c0_9, %c0_10], %20 {strides = array<i32>} : memref<2x32xf32, #tpu.memory_space<vmem>>, vector<2x32xf32>,
    return
  }
  func.func @transform_0(%arg0: i32) -> (i32, i32, i32) {
    %c0_i32 = arith.constant 0 : i32
    %c0_i32_0 = arith.constant 0 : i32
    %c0_i32_1 = arith.constant 0 : i32
    return %arg0, %c0_i32, %c0_i32_0 : i32, i32, i32
  }
  func.func @transform_1(%arg0: i32) -> (i32, i32) {
    %c0_i32 = arith.constant 0 : i32
    %c0_i32_0 = arith.constant 0 : i32
    %c0_i32_1 = arith.constant 0 : i32
    return %c0_i32, %c0_i32_0 : i32, i32
  }
  func.func @transform_2(%arg0: i32) -> (i32, i32) {
    %c0_i32 = arith.constant 0 : i32
    %c0_i32_0 = arith.constant 0 : i32
    %c0_i32_1 = arith.constant 0 : i32
    return %c0_i32, %c0_i32_0 : i32, i32
  }
  func.func @transform_3(%arg0: i32) -> (i32, i32) {
    %c0_i32 = arith.constant 0 : i32
    %c0_i32_0 = arith.constant 0 : i32
    return %arg0, %c0_i32 : i32, i32
  }
}

</mosaic_0001>

<bundles_post_ra>
// kernel: tpu_custom_call.1
= control target key start
LH: loop header
LB: loop body
LE: loop exit
PB: predicated region body
PF: predicated region fallthrough
CT: control target
= control target key end

     0   :  { %8 = vsyncpa [#allocation3], 0  ;;  %s262_s0 = inlined_call_operand.hbm [shape: f32[2,8,32], index: 0, kind: input, shape index: {}]   ;;  %s263_s1 = inlined_call_operand.vmem [shape: f32[1,32], index: 1, kind: input, shape index: {}]   ;;  %s264_s2 = inlined_call_operand.vmem [shape: f32[1,8], index: 2, kind: input, shape index: {}]   ;;  %s265_s3 = inlined_call_operand.hbm [shape: f32[2,32], index: 3, kind: output, shape index: {}]  }
   0x1   :  { %9 = vsyncpa [#allocation4], 0  ;;  %s219_s12 = smov [#allocation2]  }
   0x2   :  { %s15_s13 = sshll.u32 %s219_s12, 4  ;;  %s16_s13 = int_to_ptr.vmem [resolvable:$true] %s15_s13 }
   0x3   :  { %s183_s14 = scalar_lea.vmem %s16_s13, 256  ;;  %p188_p1 = scmp.lt.s32.totalorder %s16_s13, %s16_s13 }
   0x4   :  { %p184_p0 = scmp.ne.s32.totalorder %s16_s13, %s183_s14  ;;  %p189_p2 = scmp.lt.s32.totalorder %s183_s14, %s183_s14 }
   0x6   :  { %p190_p3 = por %p189_p2, %p188_p1 }
   0x8   :  { %p191_p4 = pnand %p190_p3, %p184_p0 }
   0xa   :  { %194 = shalt.err (!%p191_p4)
}
   0xb   :  { %s220_s15 = smov 128   ;;  %s221_s16 = smov 8  }
   0xc   :  { %21 = dma.hbm_to_vmem [thread:$0]  %s262_s0, 256, %s16_s13, [#allocation3], %s220_s15, %s220_s15, %s221_s16  }
   0xd   :  { %215 = dma.done.wait [#allocation3], 256  }
   0xe   :  { %216 = vsyncadd [#allocation3], 4294967040  ;;  %v29_v0 = vld [vmem:[#allocation2] sm:$0xff]  ;;  %vm41_vm0 = vcmask 261120   ;;  %v30_v2 = vld [vmem:[#allocation2 + $0x8] sm:$0xff]  ;;  %v222_v8 = vmov 0   ;;  %v73_v20 = vlaneseq }
   0xf   :  { %v154_v1 = vld [vmem:[%s263_s1] ss:$0 sm:$0xff]  ;;  %161 = vset.pattern.permute.xlu1 %v222_v8  ;;  %162 = vset.pattern.permute.xlu0 %v222_v8  ;;  %vm83_vm1 = vcmask 1041409   ;;  %vm86_vm2 = vcmask 58368   ;;  %s223_s0 = smov [#allocation5]   ;;  %vm137_vm3 = vcmask 254976  }
  0x10   :  { %v39_v3 = vmul.f32 %v154_v1, %v29_v0  ;;  %v40_v4 = vmul.f32 %v154_v1, %v30_v2  ;;  %v155_v5 = vld [vmem:[%s264_s2] ss:$0 sm:$0xff]  ;;  %v74_v21 = vand.u32 127, %v73_v20  ;;  %v76_v22 = vshrl.u32 %v73_v20, 7  ;;  %s145_s1 = sshll.u32 %s223_s0, 4  ;;  %s146_s1 = int_to_ptr.vmem [resolvable:$true] %s145_s1 }
  0x11   :  { %54 = vbcast.lane.b32.xlu1 %v155_v5, 256  ;;  %s195_s2 = scalar_lea.vmem %s146_s1, 32  ;;  %p200_p6 = scmp.lt.s32.totalorder %s146_s1, %s146_s1 }
  0x12   :  { %v42_v6 = vsel %vm41_vm0, %v39_v3, 0.0  ;;  %v45_v7 = vsel %vm41_vm0, %v40_v4, 0.0  ;;  %v77_v23 = vsub.s32 %v74_v21, %v76_v22  ;;  %v93_v30 = vsub.s32 0, %v76_v22  ;;  %p196_p5 = scmp.ne.s32.totalorder %s146_s1, %s195_s2  ;;  %p201_p7 = scmp.lt.s32.totalorder %s195_s2, %s195_s2 }
  0x13   :  { %43 = vadd.xlane.f32.xlu0 %v42_v6  ;;  %v97_v31 = vsub.s32 1, %v76_v22 }
  0x14   :  { %p202_p8 = por %p201_p7, %p200_p6 }
  0x16   :  { %p203_p9 = pnand %p202_p8, %p196_p5 }
  0x17   :  { %46 = vadd.xlane.f32.xlu0 %v45_v7 }
  0x83   :  { %v55_v9 = vpop.permute.xlu1 %54 }
  0x9c   :  { %v44_v10 = vpop.xlane.xlu0 %43 }
  0x9d   :  { %v57_v11 = vadd.f32 %v55_v9, %v44_v10 }
  0x9f   :  { %163 = vtanh.f32 %v57_v11 }
  0xa0   :  { %v47_v12 = vpop.xlane.xlu0 %46 }
  0xa1   :  { %v58_v13 = vadd.f32 %v55_v9, %v47_v12 }
  0xa3   :  { %165 = vtanh.f32 %v58_v13 }
  0xac   :  { %v164_v14 = vpop.eup %163 }
  0xad   :  { %v61_v15 = vmul.f32 1.442695, %v164_v14 }
  0xaf   :  { %167 = vpow2.f32 %v61_v15 }
  0xb0   :  { %v166_v16 = vpop.eup %165 }
  0xb1   :  { %v63_v17 = vmul.f32 1.442695, %v166_v16 }
  0xb3   :  { %169 = vpow2.f32 %v63_v17 }
  0xbc   :  { %v168_v18 = vpop.eup %167 }
  0xbd   :  { %68 = vperm.xlu1 %161, %v168_v18  }
  0xc0   :  { %v170_v19 = vpop.eup %169 }
  0xc1   :  { %71 = vperm.xlu0 %162, %v170_v19  }
 0x138   :  { %v69_v24 = vpop.permute.xlu1 %68 }
 0x139   :  { %v78_v26 = vrot.slane %v69_v24, %v77_v23 }
 0x13c   :  { %v72_v25 = vpop.permute.xlu0 %71 }
 0x13d   :  { %v82_v27 = vrot.slane %v72_v25, %v77_v23 }
 0x13f   :  { %v84_v28 = vsel %vm83_vm1, %v82_v27, %v78_v26 }
 0x140   :  { %v87_v29 = vsel %vm86_vm2, %v84_v28, 0.0 }
 0x141   :  { %88 = vadd.xlane.f32.xlu1 %v87_v29 }
 0x1ca   :  { %v89_v32 = vpop.xlane.xlu1 %88 }
 0x1cb   :  { %v94_v33 = vrot.slane %v89_v32, %v93_v30  ;;  %v98_v34 = vrot.slane %v89_v32, %v97_v31 }
 0x1cd   :  { %171 = vrcp.f32 %v94_v33 }
 0x1ce   :  { %173 = vrcp.f32 %v98_v34 }
 0x1da   :  { %v172_v35 = vpop.eup %171 }
 0x1db   :  { %v174_v36 = vpop.eup %173  ;;  %v102_v37 = vmul.f32 %v172_v35, %v168_v18 }
 0x1dc   :  { %v104_v38 = vmul.f32 %v174_v36, %v170_v19 }
 0x1dd   :  { %v105_v39 = vadd.f32 1e-10, %v102_v37 }
 0x1de   :  { %v106_v40 = vadd.f32 1e-10, %v104_v38 }
 0x1df   :  { %109 = vperm.xlu1 %161, %v105_v39  }
 0x1e0   :  { %114 = vperm.xlu0 %162, %v106_v40  }
 0x25a   :  { %v110_v41 = vpop.permute.xlu1 %109 }
 0x25b   :  { %v115_v42 = vpop.permute.xlu0 %114  ;;  %v117_v43 = vmul.f32 %v110_v41, %v29_v0 }
 0x25c   :  { %v118_v44 = vmul.f32 %v115_v42, %v30_v2 }
 0x25d   :  { %v119_v45 = vsel %vm41_vm0, %v117_v43, 0.0 }
 0x25e   :  { %v126_v46 = vsel %vm41_vm0, %v118_v44, 0.0  ;;  %v120_v47 = vrot.slane %v119_v45, 4 }
 0x25f   :  { %v127_v48 = vrot.slane %v126_v46, 4 }
 0x260   :  { %v121_v49 = vadd.f32 %v120_v47, %v119_v45 }
 0x261   :  { %v128_v50 = vadd.f32 %v127_v48, %v126_v46 }
 0x262   :  { %v122_v51 = vrot.slane %v121_v49, 2 }
 0x263   :  { %v129_v52 = vrot.slane %v128_v50, 2 }
 0x264   :  { %v123_v53 = vadd.f32 %v122_v51, %v121_v49 }
 0x265   :  { %v130_v54 = vadd.f32 %v129_v52, %v128_v50 }
 0x266   :  { %v124_v55 = vrot.slane %v123_v53, 1 }
 0x267   :  { %v131_v56 = vrot.slane %v130_v54, 1 }
 0x268   :  { %v125_v57 = vadd.f32 %v124_v55, %v123_v53 }
 0x269   :  { %v132_v58 = vadd.f32 %v131_v56, %v130_v54 }
 0x26b   :  { %v135_v59 = vsel %vm83_vm1, %v132_v58, %v125_v57 }
 0x26c   :  { %138 = vst.msk [vmem:[#allocation5] sm:$0x3] %vm137_vm3, %v135_v59 }
 0x26d   :  { %206 = shalt.err (!%p203_p9)
}
 0x26e   :  { %148 = dma.vmem_to_hbm [thread:$0]  %s146_s1, 32, %s265_s3, [#allocation4]  }
 0x26f   :  { %217 = dma.done.wait [#allocation4], 32  }
 0x270   :  { %218 = vsyncadd [#allocation4], 4294967264 }
 0x271   :  { %152 = vsyncpa [#allocation3], 1 }
 0x272   :  { %153 = vsyncpa [#allocation4], 1 }

</bundles_post_ra>
